<compile_context>
chip_gen: v5e
topology: v5e:2x2
jax: 0.10.0
libtpu: 0.0.40
codegen_flags: <defaults>
</compile_context>

<pallas_src>
import math

import jax
import jax.numpy as jnp
from jax.experimental import pallas as pl
from jax.experimental.pallas import tpu as pltpu

LANES = 128


def mlp_kernel(x_ref, w1_ref, b1_ref, w2_ref, b2_ref, o_ref):
    # x_ref : (TM, G*Cin)   f32      w1_ref: (G*Cin,  G*Cmid) bf16
    # b1_ref: (1, G*Cmid)   f32      w2_ref: (G*Cmid, G*Cout) bf16
    # b2_ref: (1, G*Cout)   f32      o_ref : (TM, G*Cout)     f32
    x = x_ref[...].astype(jnp.bfloat16)                              # bf16 MXU operand
    h = jnp.dot(x, w1_ref[...], preferred_element_type=jnp.float32)  # f32 accumulate
    h = jnp.maximum(h + b1_ref[...], 0.0)                            # bias + ReLU (f32)
    h = h.astype(jnp.bfloat16)                                       # one cast into matmul 2
    o = jnp.dot(h, w2_ref[...], preferred_element_type=jnp.float32) + b2_ref[...]
    o_ref[...] = o.astype(o_ref.dtype)


def _round_up(x, m):
    return (x + m - 1) // m * m


def _choose_tile(rows, G, Cin, Cmid, Cout, tm_req):
    """Pick the packed-row tile under a conservative VMEM budget, ensuring at
    least 2 grid steps when there is enough work (v7x has 2 TensorCores)."""
    # Live VMEM per packed row: double-buffered f32 x/out tiles plus in-kernel
    # f32 hidden, bf16 hidden, bf16 x copy and f32 pre-cast output.
    per_row = (2 * 4 * G * Cin      # x tile (f32, 2 pipeline buffers)
               + 2 * 4 * G * Cout   # out tile (f32, 2 pipeline buffers)
               + 4 * G * Cmid       # hidden, f32
               + 2 * G * Cmid       # hidden, bf16
               + 2 * G * Cin        # x, bf16
               + 4 * G * Cout)      # output before cast, f32
    # Resident weights / biases (2 pipeline buffers each; constant index_map).
    # TODO(synk): pipeline_mode=pl.Buffered(1) on the weight specs would halve
    # this; skipped here to keep the compile path maximally conservative.
    weights = 2 * (2 * G * Cin * G * Cmid + 2 * G * Cmid * G * Cout
                   + 4 * G * Cmid + 4 * G * Cout)
    budget = 16 << 20               # fits every generation's scoped-VMEM window
    tm_cap = max(8, (budget - weights) // per_row // 8 * 8)
    tm = min(tm_req, tm_cap)
    # >= 2 grid steps when possible so "parallel" shards across both v7x cores.
    tm = min(tm, max(8, _round_up(pl.cdiv(rows, 2), 8)))
    vmem_est = weights + per_row * tm + (2 << 20)
    vmem_limit = int(min(max(vmem_est, 16 << 20), 28 << 20))
    return tm, vmem_limit


def mlp_pallas(x_flat, w1, b1, w2, b2, *, tm_packed=1024):
    """x_flat: (M, Cin) f32 -> (M, Cout) f32; y = relu(x @ w1 + b1) @ w2 + b2."""
    M, Cin = x_flat.shape
    Cmid = w1.shape[1]
    Cout = w2.shape[1]

    # TODO(synk): add an unpacked fallback path when Cin does not divide 128.
    assert LANES % Cin == 0, "lane packing requires Cin to divide 128"
    G = LANES // Cin

    # Block-diagonal ("grouped") weights: each of the G packed rows gets its own
    # copy of W. bf16 for the MXU; biases stay f32 (added to f32 accumulator).
    w1p = jnp.kron(jnp.eye(G, dtype=w1.dtype), w1).astype(jnp.bfloat16)  # (G*Cin,  G*Cmid)
    b1p = jnp.tile(b1.reshape(1, Cmid), (1, G)).astype(jnp.float32)      # (1, G*Cmid)
    w2p = jnp.kron(jnp.eye(G, dtype=w2.dtype), w2).astype(jnp.bfloat16)  # (G*Cmid, G*Cout)
    b2p = jnp.tile(b2.reshape(1, Cout), (1, G)).astype(jnp.float32)      # (1, G*Cout)

    # Pad only to a multiple of G (< 128 extra rows) so the lane-dense reshape
    # is legal; the ragged last row-block is handled by masked output stores.
    m_pad = _round_up(M, G)
    if m_pad != M:
        x_flat = jnp.pad(x_flat, ((0, m_pad - M), (0, 0)))
    rows = m_pad // G
    x_packed = x_flat.reshape(rows, G * Cin)           # contiguous, lane-dense

    tm, vmem_limit = _choose_tile(rows, G, Cin, Cmid, Cout, tm_packed)
    grid = (pl.cdiv(rows, tm),)

    out_packed = pl.pallas_call(
        mlp_kernel,
        out_shape=jax.ShapeDtypeStruct((rows, G * Cout), x_flat.dtype),
        grid_spec=pltpu.PrefetchScalarGridSpec(
            num_scalar_prefetch=0,
            grid=grid,
            in_specs=[
                pl.BlockSpec((tm, G * Cin), lambda i: (i, 0)),
                pl.BlockSpec((G * Cin, G * Cmid), lambda i: (0, 0)),
                pl.BlockSpec((1, G * Cmid), lambda i: (0, 0)),
                pl.BlockSpec((G * Cmid, G * Cout), lambda i: (0, 0)),
                pl.BlockSpec((1, G * Cout), lambda i: (0, 0)),
            ],
            out_specs=pl.BlockSpec((tm, G * Cout), lambda i: (i, 0)),
        ),
        compiler_params=pltpu.CompilerParams(
            dimension_semantics=("parallel",),
            vmem_limit_bytes=vmem_limit,
        ),
    )(x_packed, w1p, b1p, w2p, b2p)

    return out_packed.reshape(m_pad, Cout)[:M]


def init_linear(key, fan_in, fan_out):
    """torch.nn.Linear default init (uniform +/- 1/sqrt(fan_in)).
    Weight stored as (in, out) so the kernel computes x @ W + b."""
    kw, kb = jax.random.split(key)
    bound = 1.0 / math.sqrt(fan_in)
    w = jax.random.uniform(kw, (fan_in, fan_out), jnp.float32, -bound, bound)
    b = jax.random.uniform(kb, (1, fan_out), jnp.float32, -bound, bound)
    return w, b


def mlp_forward(x, w1, b1, w2, b2):
    """x: (batch, H, W, in_channels) -> (batch, H, W, out_channels)."""
    B, H, W, Cin = x.shape
    Cout = w2.shape[1]
    y_flat = mlp_pallas(x.reshape(B * H * W, Cin), w1, b1, w2, b2)
    return y_flat.reshape(B, H, W, Cout)


if __name__ == "__main__":
    key = jax.random.PRNGKey(0)
    k_x, k_l1, k_l2 = jax.random.split(key, 3)

    batch, H, Wsp = 2, 16, 16
    in_channels, mid_channels, out_channels = 4, 32, 4

    x = jax.random.normal(k_x, (batch, H, Wsp, in_channels), jnp.float32)
    w1, b1 = init_linear(k_l1, in_channels, mid_channels)
    w2, b2 = init_linear(k_l2, mid_channels, out_channels)

    fwd = jax.jit(mlp_forward)
    y = jax.block_until_ready(fwd(x, w1, b1, w2, b2))

    # Pure-JAX f32 reference of the same math; kernel uses bf16 MXU operands
    # with f32 accumulation -> loosened tolerance.
    ref = jnp.maximum(x.reshape(-1, in_channels) @ w1 + b1, 0.0) @ w2 + b2
    ref = ref.reshape(batch, H, Wsp, out_channels)
    assert y.shape == ref.shape
    assert jnp.allclose(y, ref, atol=2e-2, rtol=2e-2)

    print("KERNEL_OK")
</pallas_src>

<mosaic_0001>
module attributes {stable_mosaic.version = 11 : i64} {
  func.func @mlp_kernel(%arg0: i32, %arg1: memref<8x128xf32, #tpu.memory_space<vmem>>, %arg2: memref<128x1024xbf16, #tpu.memory_space<vmem>>, %arg3: memref<1x1024xf32, #tpu.memory_space<vmem>>, %arg4: memref<1024x128xbf16, #tpu.memory_space<vmem>>, %arg5: memref<1x128xf32, #tpu.memory_space<vmem>>, %arg6: memref<8x128xf32, #tpu.memory_space<vmem>>) attributes {dimension_semantics = [#tpu.dimension_semantics<parallel>], iteration_bounds = array<i64: 2>, scalar_prefetch = 0 : i64, scratch_operands = 0 : i64, tpu.core_type = #tpu.core_type<tc>, window_params = [{transform_indices = @transform_0, window_bounds = array<i64: 8, 128>}, {pipeline_mode = #tpu.pipeline_mode<synchronous>, transform_indices = @transform_1, window_bounds = array<i64: 128, 1024>}, {pipeline_mode = #tpu.pipeline_mode<synchronous>, transform_indices = @transform_2, window_bounds = array<i64: 1, 1024>}, {pipeline_mode = #tpu.pipeline_mode<synchronous>, transform_indices = @transform_3, window_bounds = array<i64: 1024, 128>}, {pipeline_mode = #tpu.pipeline_mode<synchronous>, transform_indices = @transform_4, window_bounds = array<i64: 1, 128>}, {transform_indices = @transform_5, window_bounds = array<i64: 8, 128>}]} {
    %c0 = arith.constant 0 : index
    %c0_0 = arith.constant 0 : index
    %0 = vector.load %arg1[%c0, %c0_0] : memref<8x128xf32, #tpu.memory_space<vmem>>, vector<8x128xf32>
    %1 = arith.truncf %0 : vector<8x128xf32> to vector<8x128xbf16>
    %c0_1 = arith.constant 0 : index
    %c0_2 = arith.constant 0 : index
    %2 = vector.load %arg2[%c0_1, %c0_2] : memref<128x1024xbf16, #tpu.memory_space<vmem>>, vector<128x1024xbf16>
    %cst = arith.constant dense<0.000000e+00> : vector<8x1024xf32>
    %3 = tpu.matmul %1, %2, %cst {dimension_numbers = #tpu.dot_dimension_numbers<[1], [0], [0], [1], [0, 0, 1, 1], [], []>} : vector<8x128xbf16>, vector<128x1024xbf16>, vector<8x1024xf32> -> vector<8x1024xf32>
    %c0_3 = arith.constant 0 : index
    %c0_4 = arith.constant 0 : index
    %4 = vector.load %arg3[%c0_3, %c0_4] : memref<1x1024xf32, #tpu.memory_space<vmem>>, vector<1x1024xf32>
    %5 = vector.broadcast %4 : vector<1x1024xf32> to vector<8x1024xf32>
    %6 = arith.addf %3, %5 : vector<8x1024xf32>
    %cst_5 = arith.constant 0.000000e+00 : f32
    %7 = vector.broadcast %cst_5 : f32 to vector<8x1024xf32>
    %8 = arith.maximumf %6, %7 : vector<8x1024xf32>
    %9 = arith.truncf %8 : vector<8x1024xf32> to vector<8x1024xbf16>
    %c0_6 = arith.constant 0 : index
    %c0_7 = arith.constant 0 : index
    %10 = vector.load %arg4[%c0_6, %c0_7] : memref<1024x128xbf16, #tpu.memory_space<vmem>>, vector<1024x128xbf16>
    %cst_8 = arith.constant dense<0.000000e+00> : vector<8x128xf32>
    %11 = tpu.matmul %9, %10, %cst_8 {dimension_numbers = #tpu.dot_dimension_numbers<[1], [0], [0], [1], [0, 0, 1, 1], [], []>} : vector<8x1024xbf16>, vector<1024x128xbf16>, vector<8x128xf32> -> vector<8x128xf32>
    %c0_9 = arith.constant 0 : index
    %c0_10 = arith.constant 0 : index
    %12 = vector.load %arg5[%c0_9, %c0_10] : memref<1x128xf32, #tpu.memory_space<vmem>>, vector<1x128xf32>
    %13 = vector.broadcast %12 : vector<1x128xf32> to vector<8x128xf32>
    %14 = arith.addf %11, %13 : vector<8x128xf32>
    %c0_11 = arith.constant 0 : index
    %c0_12 = arith.constant 0 : index
    %15 = vector.load %arg6[%c0_11, %c0_12] : memref<8x128xf32, #tpu.memory_space<vmem>>, vector<8x128xf32>
    tpu.vector_store %arg6[%c0_11, %c0_12], %14 {strides = array<i32>} : memref<8x128xf32, #tpu.memory_space<vmem>>, vector<8x128xf32>,
    return
  }
  func.func @transform_0(%arg0: i32) -> (i32, i32) {
    %c0_i32 = arith.constant 0 : i32
    %c0_i32_0 = arith.constant 0 : i32
    return %arg0, %c0_i32 : i32, i32
  }
  func.func @transform_1(%arg0: i32) -> (i32, i32) {
    %c0_i32 = arith.constant 0 : i32
    %c0_i32_0 = arith.constant 0 : i32
    %c0_i32_1 = arith.constant 0 : i32
    return %c0_i32, %c0_i32_0 : i32, i32
  }
  func.func @transform_2(%arg0: i32) -> (i32, i32) {
    %c0_i32 = arith.constant 0 : i32
    %c0_i32_0 = arith.constant 0 : i32
    %c0_i32_1 = arith.constant 0 : i32
    return %c0_i32, %c0_i32_0 : i32, i32
  }
  func.func @transform_3(%arg0: i32) -> (i32, i32) {
    %c0_i32 = arith.constant 0 : i32
    %c0_i32_0 = arith.constant 0 : i32
    %c0_i32_1 = arith.constant 0 : i32
    return %c0_i32, %c0_i32_0 : i32, i32
  }
  func.func @transform_4(%arg0: i32) -> (i32, i32) {
    %c0_i32 = arith.constant 0 : i32
    %c0_i32_0 = arith.constant 0 : i32
    %c0_i32_1 = arith.constant 0 : i32
    return %c0_i32, %c0_i32_0 : i32, i32
  }
  func.func @transform_5(%arg0: i32) -> (i32, i32) {
    %c0_i32 = arith.constant 0 : i32
    %c0_i32_0 = arith.constant 0 : i32
    return %arg0, %c0_i32 : i32, i32
  }
}

</mosaic_0001>

<bundles_post_ra>
// kernel: mlp_forward.1
= control target key start
LH: loop header
LB: loop body
LE: loop exit
PB: predicated region body
PF: predicated region fallthrough
CT: control target
= control target key end

     0   :  { %s2114_s18 = smov 0   ;;  %s2744_s0 = inlined_call_operand.vmem [shape: f32[16,128], index: 0, kind: input, shape index: {}]   ;;  %s2745_s1 = inlined_call_operand.vmem [shape: bf16[128,1024], index: 1, kind: input, shape index: {}]   ;;  %s2746_s2 = inlined_call_operand.vmem [shape: f32[1,1024], index: 2, kind: input, shape index: {}]   ;;  %s2747_s3 = inlined_call_operand.vmem [shape: bf16[1024,128], index: 3, kind: input, shape index: {}]   ;;  %s2748_s4 = inlined_call_operand.vmem [shape: f32[1,128], index: 4, kind: input, shape index: {}]   ;;  %s2749_s5 = inlined_call_operand.vmem [shape: f32[16,128], index: 5, kind: output, shape index: {}]  }
   0x1 LB: > { %s1418_s19 = sadd.s32 4294967295, %s2082_s18   ;;  %p1422_p0 = scmp.ge.s32.totalorder %s2082_s18, 1  ;;  %s2082_s18 = sphi %s2114_s18, %s15_s18  }
   0x2   : > { %p186_p1 = scmp.lt.s32.totalorder %s2082_s18, 3 }
   0x4   : > { %p187_p2 = pnand %p1422_p0, %p186_p1 }
   0x5   : > { %p212_p3 = scmp.lt.s32.totalorder (!%p187_p2), %s1418_s19, 1 }
   0x6   : > { %190 = sbr.rel (%p187_p2) target bundleno = 358 (0x166), region = 40 }
   0xb   : > { %v1651_v0 = vld [vmem:[%s2745_s1 + $0x1c0] sm:$0xf]  ;;  %v1659_v2 = vld [vmem:[%s2745_s1 + $0x1c8] sm:$0xf]  ;;  %v1996_v5 = vld [vmem:[%s2745_s1 + $0x1cc] sm:$0xf] }
   0xc   : > { %v1999_v1 = vld [vmem:[%s2745_s1 + $0x1dc] sm:$0xf0]  ;;  %v2000_v4 = vld [vmem:[%s2745_s1 + $0x1e4] sm:$0xf0]  ;;  %v1661_v6 = vld [vmem:[%s2745_s1 + $0x1e8] sm:$0xf0] }
   0xd   : > { %v1652_v3 = vor.u32 %v1999_v1, %v1651_v0  ;;  %v1660_v7 = vor.u32 %v2000_v4, %v1659_v2  ;;  %v1664_v8 = vor.u32 %v1996_v5, %v1661_v6  ;;  %v1995_v9 = vld [vmem:[%s2745_s1 + $0x1c4] sm:$0xf]  ;;  %v1619_v11 = vld [vmem:[%s2745_s1 + $0x180] sm:$0xf]  ;;  %v1627_v14 = vld [vmem:[%s2745_s1 + $0x188] sm:$0xf] }
   0xe   : > { %v1653_v10 = vld [vmem:[%s2745_s1 + $0x1e0] sm:$0xf0]  ;;  %v1991_v13 = vld [vmem:[%s2745_s1 + $0x19c] sm:$0xf0]  ;;  %v1992_v15 = vld [vmem:[%s2745_s1 + $0x1a4] sm:$0xf0] }
   0xf   : > { %624 = vmatpush.bf16.msra.mxu0 %v1652_v3  ;;  %v1656_v12 = vor.u32 %v1995_v9, %v1653_v10  ;;  %650 = vmatpush.bf16.msra.mxu2 %v1660_v7  ;;  %v1620_v16 = vor.u32 %v1991_v13, %v1619_v11  ;;  %v1628_v17 = vor.u32 %v1992_v15, %v1627_v14  ;;  %v1988_v18 = vld [vmem:[%s2745_s1 + $0x18c] sm:$0xf]  ;;  %v1987_v20 = vld [vmem:[%s2745_s1 + $0x184] sm:$0xf]  ;;  %v1587_v23 = vld [vmem:[%s2745_s1 + $0x140] sm:$0xf] }
  0x10   : > { %663 = vmatpush.bf16.msra.mxu3 %v1664_v8  ;;  %v1629_v19 = vld [vmem:[%s2745_s1 + $0x1a8] sm:$0xf0]  ;;  %v1621_v22 = vld [vmem:[%s2745_s1 + $0x1a0] sm:$0xf0]  ;;  %v1983_v24 = vld [vmem:[%s2745_s1 + $0x15c] sm:$0xf0] }
  0x11   : > { %637 = vmatpush.bf16.msra.mxu1 %v1656_v12  ;;  %v1632_v21 = vor.u32 %v1988_v18, %v1629_v19  ;;  %v1624_v25 = vor.u32 %v1987_v20, %v1621_v22  ;;  %v1595_v26 = vld [vmem:[%s2745_s1 + $0x148] sm:$0xf]  ;;  %v1980_v28 = vld [vmem:[%s2745_s1 + $0x14c] sm:$0xf]  ;;  %v1588_v29 = vor.u32 %v1983_v24, %v1587_v23  ;;  %v1979_v31 = vld [vmem:[%s2745_s1 + $0x144] sm:$0xf] }
  0x12   : > { %v1984_v27 = vld [vmem:[%s2745_s1 + $0x164] sm:$0xf0]  ;;  %v1597_v30 = vld [vmem:[%s2745_s1 + $0x168] sm:$0xf0]  ;;  %v1589_v32 = vld [vmem:[%s2745_s1 + $0x160] sm:$0xf0] }
  0x13   : > { %625 = vmatpush.bf16.msra.mxu0 %v1620_v16  ;;  %651 = vmatpush.bf16.msra.mxu2 %v1628_v17  ;;  %v1596_v33 = vor.u32 %v1984_v27, %v1595_v26  ;;  %v1600_v34 = vor.u32 %v1980_v28, %v1597_v30  ;;  %v1555_v35 = vld [vmem:[%s2745_s1 + $0x100] sm:$0xf]  ;;  %v1563_v37 = vld [vmem:[%s2745_s1 + $0x108] sm:$0xf]  ;;  %v1592_v38 = vor.u32 %v1979_v31, %v1589_v32  ;;  %v1972_v40 = vld [vmem:[%s2745_s1 + $0x10c] sm:$0xf] }
  0x14   : > { %664 = vmatpush.bf16.msra.mxu3 %v1632_v21  ;;  %v1975_v36 = vld [vmem:[%s2745_s1 + $0x11c] sm:$0xf0]  ;;  %v1976_v39 = vld [vmem:[%s2745_s1 + $0x124] sm:$0xf0]  ;;  %v1565_v41 = vld [vmem:[%s2745_s1 + $0x128] sm:$0xf0] }
  0x15   : > { %638 = vmatpush.bf16.msra.mxu1 %v1624_v25  ;;  %v1971_v42 = vld [vmem:[%s2745_s1 + $0x104] sm:$0xf]  ;;  %v1556_v44 = vor.u32 %v1975_v36, %v1555_v35  ;;  %v1564_v45 = vor.u32 %v1976_v39, %v1563_v37  ;;  %v1568_v46 = vor.u32 %v1972_v40, %v1565_v41  ;;  %v1523_v47 = vld [vmem:[%s2745_s1 + $0xc0] sm:$0xf]  ;;  %v1531_v49 = vld [vmem:[%s2745_s1 + $0xc8] sm:$0xf] }
  0x16   : > { %v1557_v43 = vld [vmem:[%s2745_s1 + $0x120] sm:$0xf0]  ;;  %v1967_v48 = vld [vmem:[%s2745_s1 + $0xdc] sm:$0xf0]  ;;  %v1968_v51 = vld [vmem:[%s2745_s1 + $0xe4] sm:$0xf0] }
  0x17   : > { %626 = vmatpush.bf16.msra.mxu0 %v1588_v29  ;;  %652 = vmatpush.bf16.msra.mxu2 %v1596_v33  ;;  %v1560_v50 = vor.u32 %v1971_v42, %v1557_v43  ;;  %v1964_v52 = vld [vmem:[%s2745_s1 + $0xcc] sm:$0xf]  ;;  %v1963_v54 = vld [vmem:[%s2745_s1 + $0xc4] sm:$0xf]  ;;  %v1524_v56 = vor.u32 %v1967_v48, %v1523_v47  ;;  %v1532_v57 = vor.u32 %v1968_v51, %v1531_v49  ;;  %v1491_v59 = vld [vmem:[%s2745_s1 + $0x80] sm:$0xf] }
  0x18   : > { %665 = vmatpush.bf16.msra.mxu3 %v1600_v34  ;;  %v1533_v53 = vld [vmem:[%s2745_s1 + $0xe8] sm:$0xf0]  ;;  %v1525_v55 = vld [vmem:[%s2745_s1 + $0xe0] sm:$0xf0]  ;;  %v1959_v60 = vld [vmem:[%s2745_s1 + $0x9c] sm:$0xf0] }
  0x19   : > { %639 = vmatpush.bf16.msra.mxu1 %v1592_v38  ;;  %v1536_v58 = vor.u32 %v1964_v52, %v1533_v53  ;;  %v1499_v61 = vld [vmem:[%s2745_s1 + $0x88] sm:$0xf]  ;;  %v1528_v62 = vor.u32 %v1963_v54, %v1525_v55  ;;  %v1956_v0 = vld [vmem:[%s2745_s1 + $0x8c] sm:$0xf]  ;;  %v1955_v2 = vld [vmem:[%s2745_s1 + $0x84] sm:$0xf]  ;;  %v1492_v4 = vor.u32 %v1959_v60, %v1491_v59 }
  0x1a   : > { %v1960_v63 = vld [vmem:[%s2745_s1 + $0xa4] sm:$0xf0]  ;;  %v1501_v1 = vld [vmem:[%s2745_s1 + $0xa8] sm:$0xf0]  ;;  %v1493_v3 = vld [vmem:[%s2745_s1 + $0xa0] sm:$0xf0] }
  0x1b   : > { %627 = vmatpush.bf16.msra.mxu0 %v1556_v44  ;;  %653 = vmatpush.bf16.msra.mxu2 %v1564_v45  ;;  %v1500_v5 = vor.u32 %v1960_v63, %v1499_v61  ;;  %v1504_v6 = vor.u32 %v1956_v0, %v1501_v1  ;;  %v1459_v7 = vld [vmem:[%s2745_s1 + $0x40] sm:$0xf]  ;;  %v1467_v9 = vld [vmem:[%s2745_s1 + $0x48] sm:$0xf]  ;;  %v1496_v10 = vor.u32 %v1955_v2, %v1493_v3  ;;  %v1948_v12 = vld [vmem:[%s2745_s1 + $0x4c] sm:$0xf] }
  0x1c   : > { %666 = vmatpush.bf16.msra.mxu3 %v1568_v46  ;;  %v1951_v8 = vld [vmem:[%s2745_s1 + $0x5c] sm:$0xf0]  ;;  %v1952_v11 = vld [vmem:[%s2745_s1 + $0x64] sm:$0xf0]  ;;  %v1469_v13 = vld [vmem:[%s2745_s1 + $0x68] sm:$0xf0] }
  0x1d   : > { %640 = vmatpush.bf16.msra.mxu1 %v1560_v50  ;;  %v1947_v14 = vld [vmem:[%s2745_s1 + $0x44] sm:$0xf]  ;;  %v1460_v16 = vor.u32 %v1951_v8, %v1459_v7  ;;  %v1427_v17 = vld [vmem:[%s2745_s1] sm:$0xf]  ;;  %v1435_v19 = vld [vmem:[%s2745_s1 + $0x8] sm:$0xf]  ;;  %v1468_v20 = vor.u32 %v1952_v11, %v1467_v9  ;;  %v1472_v21 = vor.u32 %v1948_v12, %v1469_v13 }
  0x1e   : > { %v1461_v15 = vld [vmem:[%s2745_s1 + $0x60] sm:$0xf0]  ;;  %v1943_v18 = vld [vmem:[%s2745_s1 + $0x1c] sm:$0xf0]  ;;  %v1944_v22 = vld [vmem:[%s2745_s1 + $0x24] sm:$0xf0] }
  0x1f   : > { %628 = vmatpush.bf16.msra.mxu0 %v1524_v56  ;;  %654 = vmatpush.bf16.msra.mxu2 %v1532_v57  ;;  %v1940_v23 = vld [vmem:[%s2745_s1 + $0xc] sm:$0xf]  ;;  %v1464_v25 = vor.u32 %v1947_v14, %v1461_v15  ;;  %v1667_v26 = vld [vmem:[%s2745_s1 + $0x1d0] sm:$0xf]  ;;  %v1675_v28 = vld [vmem:[%s2745_s1 + $0x1d8] sm:$0xf]  ;;  %v1428_v31 = vor.u32 %v1943_v18, %v1427_v17  ;;  %v1436_v35 = vor.u32 %v1944_v22, %v1435_v19 }
  0x20   : > { %667 = vmatpush.bf16.msra.mxu3 %v1536_v58  ;;  %v1437_v24 = vld [vmem:[%s2745_s1 + $0x28] sm:$0xf0]  ;;  %v2001_v27 = vld [vmem:[%s2745_s1 + $0x1ec] sm:$0xf0]  ;;  %v2002_v29 = vld [vmem:[%s2745_s1 + $0x1f4] sm:$0xf0] }
  0x21   : > { %641 = vmatpush.bf16.msra.mxu1 %v1528_v62  ;;  %v1998_v30 = vld [vmem:[%s2745_s1 + $0x1dc] sm:$0xf]  ;;  %v1939_v33 = vld [vmem:[%s2745_s1 + $0x4] sm:$0xf]  ;;  %v1440_v36 = vor.u32 %v1940_v23, %v1437_v24  ;;  %v1997_v37 = vld [vmem:[%s2745_s1 + $0x1d4] sm:$0xf]  ;;  %v1668_v39 = vor.u32 %v2001_v27, %v1667_v26  ;;  %v1676_v40 = vor.u32 %v2002_v29, %v1675_v28 }
  0x22   : > { %v1677_v32 = vld [vmem:[%s2745_s1 + $0x1f8] sm:$0xf0]  ;;  %v1429_v34 = vld [vmem:[%s2745_s1 + $0x20] sm:$0xf0]  ;;  %v1669_v38 = vld [vmem:[%s2745_s1 + $0x1f0] sm:$0xf0] }
  0x23   : > { %629 = vmatpush.bf16.msra.mxu0 %v1492_v4  ;;  %655 = vmatpush.bf16.msra.mxu2 %v1500_v5  ;;  %s2751_s19 = smov (!%p212_p3, %s1418_s19), 1  ;;  %v1635_v41 = vld [vmem:[%s2745_s1 + $0x190] sm:$0xf]  ;;  %v1680_v43 = vor.u32 %v1998_v30, %v1677_v32  ;;  %v1432_v44 = vor.u32 %v1939_v33, %v1429_v34  ;;  %v1643_v45 = vld [vmem:[%s2745_s1 + $0x198] sm:$0xf]  ;;  %v1672_v47 = vor.u32 %v1997_v37, %v1669_v38 }
  0x24   : > { %668 = vmatpush.bf16.msra.mxu3 %v1504_v6  ;;  %v1993_v42 = vld [vmem:[%s2745_s1 + $0x1ac] sm:$0xf0]  ;;  %v1994_v46 = vld [vmem:[%s2745_s1 + $0x1b4] sm:$0xf0]  ;;  %s1423_s9 = sshll.u32 %s2751_s19, 3 }
  0x25   : > { %642 = vmatpush.bf16.msra.mxu1 %v1496_v10  ;;  %v1990_v48 = vld [vmem:[%s2745_s1 + $0x19c] sm:$0xf]  ;;  %s215_s16 = scalar_lea.vmem %s2744_s0, %s1423_s9  ;;  %v1989_v50 = vld [vmem:[%s2745_s1 + $0x194] sm:$0xf]  ;;  %v1636_v53 = vor.u32 %v1993_v42, %v1635_v41  ;;  %v1644_v54 = vor.u32 %v1994_v46, %v1643_v45  ;;  %v1603_v56 = vld [vmem:[%s2745_s1 + $0x150] sm:$0xf]  ;;  %s219_s8 = scalar_lea.vmem %s2749_s5, %s1423_s9 }
  0x26   : > { %v1645_v49 = vld [vmem:[%s2745_s1 + $0x1b8] sm:$0xf0]  ;;  %v1637_v51 = vld [vmem:[%s2745_s1 + $0x1b0] sm:$0xf0]  ;;  %v220_v52 = vld [vmem:[%s215_s16] sm:$0xff] }
  0x27   : > { %630 = vmatpush.bf16.msra.mxu0 %v1460_v16  ;;  %656 = vmatpush.bf16.msra.mxu2 %v1468_v20  ;;  %v2374_v55 = vpack.c.bf16 %v220_v52, %v220_v52  ;;  %v1648_v57 = vor.u32 %v1990_v48, %v1645_v49  ;;  %v1985_v58 = vld [vmem:[%s2745_s1 + $0x16c] sm:$0xf0]  ;;  %v1611_v59 = vld [vmem:[%s2745_s1 + $0x158] sm:$0xf]  ;;  %v1640_v61 = vor.u32 %v1989_v50, %v1637_v51  ;;  %v1982_v62 = vld [vmem:[%s2745_s1 + $0x15c] sm:$0xf] }
  0x28   : > { %669 = vmatpush.bf16.msra.mxu3 %v1472_v21  ;;  %v1986_v60 = vld [vmem:[%s2745_s1 + $0x174] sm:$0xf0]  ;;  %v1613_v63 = vld [vmem:[%s2745_s1 + $0x178] sm:$0xf0]  ;;  %v1981_v0 = vld [vmem:[%s2745_s1 + $0x154] sm:$0xf]  ;;  %v1604_v2 = vor.u32 %v1985_v58, %v1603_v56 }
  0x29   : > { %643 = vmatpush.bf16.msra.mxu1 %v1464_v25  ;;  %v1605_v1 = vld [vmem:[%s2745_s1 + $0x170] sm:$0xf0]  ;;  %v1612_v3 = vor.u32 %v1986_v60, %v1611_v59  ;;  %v1571_v4 = vld [vmem:[%s2745_s1 + $0x110] sm:$0xf]  ;;  %v1616_v5 = vor.u32 %v1982_v62, %v1613_v63  ;;  %v1579_v7 = vld [vmem:[%s2745_s1 + $0x118] sm:$0xf] }
  0x2a   : > { %v1977_v6 = vld [vmem:[%s2745_s1 + $0x12c] sm:$0xf0]  ;;  %v1978_v8 = vld [vmem:[%s2745_s1 + $0x134] sm:$0xf0]  ;;  %v1608_v9 = vor.u32 %v1981_v0, %v1605_v1  ;;  %v1974_v10 = vld [vmem:[%s2745_s1 + $0x11c] sm:$0xf] }
  0x2b   : > { %631 = vmatpush.bf16.msra.mxu0 %v1428_v31  ;;  %657 = vmatpush.bf16.msra.mxu2 %v1436_v35  ;;  %v1581_v11 = vld [vmem:[%s2745_s1 + $0x138] sm:$0xf0]  ;;  %v1973_v12 = vld [vmem:[%s2745_s1 + $0x114] sm:$0xf]  ;;  %v1572_v14 = vor.u32 %v1977_v6, %v1571_v4  ;;  %v1580_v15 = vor.u32 %v1978_v8, %v1579_v7  ;;  %v1539_v16 = vld [vmem:[%s2745_s1 + $0xd0] sm:$0xf] }
  0x2c   : > { %670 = vmatpush.bf16.msra.mxu3 %v1440_v36  ;;  %v1573_v13 = vld [vmem:[%s2745_s1 + $0x130] sm:$0xf0]  ;;  %v1584_v17 = vor.u32 %v1974_v10, %v1581_v11  ;;  %v1969_v18 = vld [vmem:[%s2745_s1 + $0xec] sm:$0xf0]  ;;  %v1547_v19 = vld [vmem:[%s2745_s1 + $0xd8] sm:$0xf] }
  0x2d   : > { %644 = vmatpush.bf16.msra.mxu1 %v1432_v44  ;;  %v1970_v20 = vld [vmem:[%s2745_s1 + $0xf4] sm:$0xf0]  ;;  %v1576_v21 = vor.u32 %v1973_v12, %v1573_v13  ;;  %v1966_v22 = vld [vmem:[%s2745_s1 + $0xdc] sm:$0xf]  ;;  %v1965_v24 = vld [vmem:[%s2745_s1 + $0xd4] sm:$0xf]  ;;  %v1540_v26 = vor.u32 %v1969_v18, %v1539_v16 }
  0x2e   : > { %658 = vmatmul.bf16.vlgmr.msra.gmra.mxu2 %v2374_v55  ;;  %632 = vmatmul.bf16.vlgmr.msra.gmra.mxu0 %v2374_v55  ;;  %v1549_v23 = vld [vmem:[%s2745_s1 + $0xf8] sm:$0xf0]  ;;  %v1541_v25 = vld [vmem:[%s2745_s1 + $0xf0] sm:$0xf0]  ;;  %v1548_v27 = vor.u32 %v1970_v20, %v1547_v19  ;;  %v1507_v28 = vld [vmem:[%s2745_s1 + $0x90] sm:$0xf] }
  0x2f   : > { %676 = vmatpush.bf16.msrb.mxu0 %v1668_v39  ;;  %702 = vmatpush.bf16.msrb.mxu2 %v1676_v40  ;;  %v1552_v29 = vor.u32 %v1966_v22, %v1549_v23  ;;  %v1961_v30 = vld [vmem:[%s2745_s1 + $0xac] sm:$0xf0]  ;;  %v1515_v31 = vld [vmem:[%s2745_s1 + $0x98] sm:$0xf]  ;;  %v1544_v33 = vor.u32 %v1965_v24, %v1541_v25  ;;  %v1958_v34 = vld [vmem:[%s2745_s1 + $0x9c] sm:$0xf] }
  0x30   : > { %715 = vmatpush.bf16.msrb.mxu3 %v1680_v43  ;;  %645 = vmatmul.bf16.vlgmr.msra.gmra.mxu1 %v2374_v55  ;;  %v1962_v32 = vld [vmem:[%s2745_s1 + $0xb4] sm:$0xf0]  ;;  %v1517_v35 = vld [vmem:[%s2745_s1 + $0xb8] sm:$0xf0]  ;;  %v1957_v36 = vld [vmem:[%s2745_s1 + $0x94] sm:$0xf]  ;;  %v1508_v38 = vor.u32 %v1961_v30, %v1507_v28 }
  0x31   : > { %689 = vmatpush.bf16.msrb.mxu1 %v1672_v47  ;;  %671 = vmatmul.bf16.vlgmr.msra.gmra.mxu3 %v2374_v55  ;;  %v1509_v37 = vld [vmem:[%s2745_s1 + $0xb0] sm:$0xf0]  ;;  %v1516_v39 = vor.u32 %v1962_v32, %v1515_v31  ;;  %v1475_v40 = vld [vmem:[%s2745_s1 + $0x50] sm:$0xf]  ;;  %v1520_v42 = vor.u32 %v1958_v34, %v1517_v35  ;;  %v1483_v43 = vld [vmem:[%s2745_s1 + $0x58] sm:$0xf] }
  0x32   : > { %v1953_v41 = vld [vmem:[%s2745_s1 + $0x6c] sm:$0xf0]  ;;  %v1954_v44 = vld [vmem:[%s2745_s1 + $0x74] sm:$0xf0]  ;;  %v1512_v45 = vor.u32 %v1957_v36, %v1509_v37  ;;  %v1950_v46 = vld [vmem:[%s2745_s1 + $0x5c] sm:$0xf] }
  0x33   : > { %677 = vmatpush.bf16.msrb.mxu0 %v1636_v53  ;;  %703 = vmatpush.bf16.msrb.mxu2 %v1644_v54  ;;  %v1485_v47 = vld [vmem:[%s2745_s1 + $0x78] sm:$0xf0]  ;;  %v1949_v48 = vld [vmem:[%s2745_s1 + $0x54] sm:$0xf]  ;;  %v1476_v50 = vor.u32 %v1953_v41, %v1475_v40  ;;  %v1484_v51 = vor.u32 %v1954_v44, %v1483_v43  ;;  %v1443_v52 = vld [vmem:[%s2745_s1 + $0x10] sm:$0xf] }
  0x34   : > { %716 = vmatpush.bf16.msrb.mxu3 %v1648_v57  ;;  %v1477_v49 = vld [vmem:[%s2745_s1 + $0x70] sm:$0xf0]  ;;  %v1488_v53 = vor.u32 %v1950_v46, %v1485_v47  ;;  %v1945_v54 = vld [vmem:[%s2745_s1 + $0x2c] sm:$0xf0]  ;;  %v1451_v56 = vld [vmem:[%s2745_s1 + $0x18] sm:$0xf] }
  0x35   : > { %690 = vmatpush.bf16.msrb.mxu1 %v1640_v61  ;;  %v1946_v57 = vld [vmem:[%s2745_s1 + $0x34] sm:$0xf0]  ;;  %v1480_v58 = vor.u32 %v1949_v48, %v1477_v49  ;;  %v1942_v59 = vld [vmem:[%s2745_s1 + $0x1c] sm:$0xf]  ;;  %v1941_v61 = vld [vmem:[%s2745_s1 + $0x14] sm:$0xf]  ;;  %v1444_v63 = vor.u32 %v1945_v54, %v1443_v52 }
  0x36   : > { %v1453_v60 = vld [vmem:[%s2745_s1 + $0x38] sm:$0xf0]  ;;  %v1445_v62 = vld [vmem:[%s2745_s1 + $0x30] sm:$0xf0]  ;;  %v1452_v0 = vor.u32 %v1946_v57, %v1451_v56  ;;  %v2008_v10 = vld [vmem:[%s2747_s3 + $0x28] sm:$0xff] }
  0x37   : > { %678 = vmatpush.bf16.msrb.mxu0 %v1604_v2  ;;  %704 = vmatpush.bf16.msrb.mxu2 %v1612_v3  ;;  %v1456_v1 = vor.u32 %v1942_v59, %v1453_v60  ;;  %v2010_v2 = vld [vmem:[%s2747_s3 + $0x38] sm:$0xff]  ;;  %v1448_v3 = vor.u32 %v1941_v61, %v1445_v62  ;;  %v2009_v6 = vld [vmem:[%s2747_s3 + $0x30] sm:$0xff]  ;;  %v2024_v12 = vld [vmem:[%s2747_s3 + $0xa8] sm:$0xff] }
  0x38   : > { %717 = vmatpush.bf16.msrb.mxu3 %v1616_v5  ;;  %v2026_v4 = vld [vmem:[%s2747_s3 + $0xb8] sm:$0xff]  ;;  %v2025_v8 = vld [vmem:[%s2747_s3 + $0xb0] sm:$0xff]  ;;  %v2007_v13 = vld [vmem:[%s2747_s3 + $0x20] sm:$0xff] }
  0x39   : > { %691 = vmatpush.bf16.msrb.mxu1 %v1608_v9  ;;  %v2018_v5 = vld [vmem:[%s2747_s3 + $0x78] sm:$0xff]  ;;  %v2017_v9 = vld [vmem:[%s2747_s3 + $0x70] sm:$0xff]  ;;  %v2015_v16 = vld [vmem:[%s2747_s3 + $0x60] sm:$0xff] }
  0x3a   : > { %v2034_v7 = vld [vmem:[%s2747_s3 + $0xf8] sm:$0xff]  ;;  %v2033_v11 = vld [vmem:[%s2747_s3 + $0xf0] sm:$0xff]  ;;  %v2031_v18 = vld [vmem:[%s2747_s3 + $0xe0] sm:$0xff] }
  0x3b   : > { %679 = vmatpush.bf16.msrb.mxu0 %v1572_v14  ;;  %705 = vmatpush.bf16.msrb.mxu2 %v1580_v15  ;;  %v2032_v14 = vld [vmem:[%s2747_s3 + $0xe8] sm:$0xff]  ;;  %v2023_v15 = vld [vmem:[%s2747_s3 + $0xa0] sm:$0xff]  ;;  %v2022_v19 = vld [vmem:[%s2747_s3 + $0x98] sm:$0xff] }
  0x3c   : > { %718 = vmatpush.bf16.msrb.mxu3 %v1584_v17  ;;  %v2006_v17 = vld [vmem:[%s2747_s3 + $0x18] sm:$0xff]  ;;  %v2021_v23 = vld [vmem:[%s2747_s3 + $0x90] sm:$0xff]  ;;  %v2004_v25 = vld [vmem:[%s2747_s3 + $0x8] sm:$0xff] }
  0x3d   : > { %692 = vmatpush.bf16.msrb.mxu1 %v1576_v21  ;;  %v2014_v20 = vld [vmem:[%s2747_s3 + $0x58] sm:$0xff]  ;;  %v2005_v21 = vld [vmem:[%s2747_s3 + $0x10] sm:$0xff]  ;;  %v2012_v28 = vld [vmem:[%s2747_s3 + $0x48] sm:$0xff] }
  0x3e   : > { %v2030_v22 = vld [vmem:[%s2747_s3 + $0xd8] sm:$0xff]  ;;  %v2013_v24 = vld [vmem:[%s2747_s3 + $0x50] sm:$0xff]  ;;  %v2028_v31 = vld [vmem:[%s2747_s3 + $0xc8] sm:$0xff] }
  0x3f   : > { %680 = vmatpush.bf16.msrb.mxu0 %v1540_v26  ;;  %706 = vmatpush.bf16.msrb.mxu2 %v1548_v27  ;;  %v2029_v26 = vld [vmem:[%s2747_s3 + $0xd0] sm:$0xff]  ;;  %v2020_v27 = vld [vmem:[%s2747_s3 + $0x88] sm:$0xff]  ;;  %v2042_v30 = vld [vmem:[%s2747_s3 + $0x138] sm:$0xff] }
  0x40   : > { %719 = vmatpush.bf16.msrb.mxu3 %v1552_v29  ;;  %v2003_v29 = vld [vmem:[%s2747_s3] sm:$0xff]  ;;  %v2050_v34 = vld [vmem:[%s2747_s3 + $0x178] sm:$0xff]  ;;  %v2041_v35 = vld [vmem:[%s2747_s3 + $0x130] sm:$0xff] }
  0x41   : > { %693 = vmatpush.bf16.msrb.mxu1 %v1544_v33  ;;  %v2019_v32 = vld [vmem:[%s2747_s3 + $0x80] sm:$0xff]  ;;  %v2049_v37 = vld [vmem:[%s2747_s3 + $0x170] sm:$0xff]  ;;  %v2040_v40 = vld [vmem:[%s2747_s3 + $0x128] sm:$0xff] }
  0x42   : > { %v2011_v33 = vld [vmem:[%s2747_s3 + $0x40] sm:$0xff]  ;;  %v2048_v41 = vld [vmem:[%s2747_s3 + $0x168] sm:$0xff]  ;;  %v2065_v43 = vld [vmem:[%s2747_s3 + $0x1f0] sm:$0xff] }
  0x43   : > { %681 = vmatpush.bf16.msrb.mxu0 %v1508_v38  ;;  %707 = vmatpush.bf16.msrb.mxu2 %v1516_v39  ;;  %v2027_v36 = vld [vmem:[%s2747_s3 + $0xc0] sm:$0xff]  ;;  %v2058_v38 = vld [vmem:[%s2747_s3 + $0x1b8] sm:$0xff]  ;;  %v2056_v46 = vld [vmem:[%s2747_s3 + $0x1a8] sm:$0xff] }
  0x44   : > { %720 = vmatpush.bf16.msrb.mxu3 %v1520_v42  ;;  %v2066_v39 = vld [vmem:[%s2747_s3 + $0x1f8] sm:$0xff]  ;;  %v2057_v42 = vld [vmem:[%s2747_s3 + $0x1b0] sm:$0xff]  ;;  %v2039_v44 = vld [vmem:[%s2747_s3 + $0x120] sm:$0xff] }
  0x45   : > { %694 = vmatpush.bf16.msrb.mxu1 %v1512_v45  ;;  %v2047_v45 = vld [vmem:[%s2747_s3 + $0x160] sm:$0xff]  ;;  %v2064_v47 = vld [vmem:[%s2747_s3 + $0x1e8] sm:$0xff]  ;;  %v2038_v48 = vld [vmem:[%s2747_s3 + $0x118] sm:$0xff] }
  0x46   : > { %v2046_v49 = vld [vmem:[%s2747_s3 + $0x158] sm:$0xff]  ;;  %v2037_v52 = vld [vmem:[%s2747_s3 + $0x110] sm:$0xff]  ;;  %v2036_v57 = vld [vmem:[%s2747_s3 + $0x108] sm:$0xff] }
  0x47   : > { %682 = vmatpush.bf16.msrb.mxu0 %v1476_v50  ;;  %708 = vmatpush.bf16.msrb.mxu2 %v1484_v51  ;;  %v2055_v50 = vld [vmem:[%s2747_s3 + $0x1a0] sm:$0xff]  ;;  %v2054_v54 = vld [vmem:[%s2747_s3 + $0x198] sm:$0xff]  ;;  %v2044_v60 = vld [vmem:[%s2747_s3 + $0x148] sm:$0xff] }
  0x48   : > { %721 = vmatpush.bf16.msrb.mxu3 %v1488_v53  ;;  %v2063_v51 = vld [vmem:[%s2747_s3 + $0x1e0] sm:$0xff]  ;;  %v2045_v53 = vld [vmem:[%s2747_s3 + $0x150] sm:$0xff]  ;;  %v2062_v56 = vld [vmem:[%s2747_s3 + $0x1d8] sm:$0xff] }
  0x49   : > { %695 = vmatpush.bf16.msrb.mxu1 %v1480_v58  ;;  %v2696_v58 = vld [vmem:[%s2746_s2] sm:$0xff]  ;;  %v2053_v61 = vld [vmem:[%s2747_s3 + $0x190] sm:$0xff] }
  0x4a   : > { %v288_v59 = vperm.slane %v2696_v58, 0  ;;  %v2061_v62 = vld [vmem:[%s2747_s3 + $0x1d0] sm:$0xff] }
  0x4b   : > { %683 = vmatpush.bf16.msrb.mxu0 %v1444_v63  ;;  %709 = vmatpush.bf16.msrb.mxu2 %v1452_v0  ;;  %v289_v63 = vperm.slane %v2696_v58, 1  ;;  %v2035_v0 = vld [vmem:[%s2747_s3 + $0x100] sm:$0xff] }
  0x4c   : > { %722 = vmatpush.bf16.msrb.mxu3 %v1456_v1 }
  0x4d   : > { %696 = vmatpush.bf16.msrb.mxu1 %v1448_v3  ;;  %v2043_v3 = vld [vmem:[%s2747_s3 + $0x140] sm:$0xff] }
  0x4e   : > { %684 = vmatmul.bf16.vlgmr.msrb.gmra.mxu0 %v2374_v55  ;;  %710 = vmatmul.bf16.vlgmr.msrb.gmra.mxu2 %v2374_v55 }
  0x4f   : > { %1260 = vmatpush.bf16.msra.mxu0 %v2010_v2  ;;  %1286 = vmatpush.bf16.msra.mxu2 %v2026_v4  ;;  %v2052_v4 = vld [vmem:[%s2747_s3 + $0x188] sm:$0xff] }
  0x50   : > { %723 = vmatmul.bf16.vlgmr.msrb.gmra.mxu3 %v2374_v55  ;;  %697 = vmatmul.bf16.vlgmr.msrb.gmra.mxu1 %v2374_v55  ;;  %v2016_v55 = vld [vmem:[%s2747_s3 + $0x68] sm:$0xff] }
  0x51   : > { %1273 = vmatpush.bf16.msra.mxu1 %v2018_v5  ;;  %1299 = vmatpush.bf16.msra.mxu3 %v2034_v7  ;;  %v2060_v5 = vld [vmem:[%s2747_s3 + $0x1c8] sm:$0xff] }
  0x53   : > { %1261 = vmatpush.bf16.msra.mxu0 %v2009_v6  ;;  %1287 = vmatpush.bf16.msra.mxu2 %v2025_v8  ;;  %v290_v6 = vperm.slane %v2696_v58, 2  ;;  %v291_v8 = vperm.slane %v2696_v58, 3 }
  0x55   : > { %1274 = vmatpush.bf16.msra.mxu1 %v2017_v9  ;;  %1300 = vmatpush.bf16.msra.mxu3 %v2033_v11 }
  0x57   : > { %1262 = vmatpush.bf16.msra.mxu0 %v2008_v10  ;;  %1288 = vmatpush.bf16.msra.mxu2 %v2024_v12 }
  0x59   : > { %1275 = vmatpush.bf16.msra.mxu1 %v2016_v55  ;;  %1301 = vmatpush.bf16.msra.mxu3 %v2032_v14  ;;  %v2059_v14 = vld [vmem:[%s2747_s3 + $0x1c0] sm:$0xff] }
  0x5b   : > { %1263 = vmatpush.bf16.msra.mxu0 %v2007_v13  ;;  %1289 = vmatpush.bf16.msra.mxu2 %v2023_v15  ;;  %v2051_v13 = vld [vmem:[%s2747_s3 + $0x180] sm:$0xff] }
  0x5d   : > { %1276 = vmatpush.bf16.msra.mxu1 %v2015_v16  ;;  %1302 = vmatpush.bf16.msra.mxu3 %v2031_v18 }
  0x5f   : > { %1264 = vmatpush.bf16.msra.mxu0 %v2006_v17  ;;  %1290 = vmatpush.bf16.msra.mxu2 %v2022_v19 }
  0x61   : > { %1277 = vmatpush.bf16.msra.mxu1 %v2014_v20  ;;  %1303 = vmatpush.bf16.msra.mxu3 %v2030_v22 }
  0x63   : > { %1265 = vmatpush.bf16.msra.mxu0 %v2005_v21  ;;  %1291 = vmatpush.bf16.msra.mxu2 %v2021_v23 }
  0x65   : > { %1278 = vmatpush.bf16.msra.mxu1 %v2013_v24  ;;  %1304 = vmatpush.bf16.msra.mxu3 %v2029_v26 }
  0x67   : > { %1266 = vmatpush.bf16.msra.mxu0 %v2004_v25  ;;  %1292 = vmatpush.bf16.msra.mxu2 %v2020_v27  ;;  %v292_v27 = vperm.slane %v2696_v58, 4 }
  0x69   : > { %1279 = vmatpush.bf16.msra.mxu1 %v2012_v28  ;;  %1305 = vmatpush.bf16.msra.mxu3 %v2028_v31  ;;  %v293_v28 = vperm.slane %v2696_v58, 5 }
  0x6b   : > { %1267 = vmatpush.bf16.msra.mxu0 %v2003_v29  ;;  %1293 = vmatpush.bf16.msra.mxu2 %v2019_v32 }
  0x6d   : > { %1280 = vmatpush.bf16.msra.mxu1 %v2011_v33  ;;  %1306 = vmatpush.bf16.msra.mxu3 %v2027_v36 }
  0x6f   : > { %1312 = vmatpush.bf16.msrb.mxu0 %v2042_v30  ;;  %1338 = vmatpush.bf16.msrb.mxu2 %v2058_v38 }
  0x71   : > { %1325 = vmatpush.bf16.msrb.mxu1 %v2050_v34  ;;  %1351 = vmatpush.bf16.msrb.mxu3 %v2066_v39  ;;  %v294_v34 = vperm.slane %v2696_v58, 6 }
  0x73   : > { %1313 = vmatpush.bf16.msrb.mxu0 %v2041_v35  ;;  %1339 = vmatpush.bf16.msrb.mxu2 %v2057_v42  ;;  %v295_v35 = vperm.slane %v2696_v58, 7  ;;  %v2075_v58 = vld [vmem:[%s2748_s4] ss:$0 sm:$0xff] }
  0x75   : > { %1326 = vmatpush.bf16.msrb.mxu1 %v2049_v37  ;;  %1352 = vmatpush.bf16.msrb.mxu3 %v2065_v43 }
  0x77   : > { %1314 = vmatpush.bf16.msrb.mxu0 %v2040_v40  ;;  %1340 = vmatpush.bf16.msrb.mxu2 %v2056_v46 }
  0x79   : > { %1327 = vmatpush.bf16.msrb.mxu1 %v2048_v41  ;;  %1353 = vmatpush.bf16.msrb.mxu3 %v2064_v47 }
  0x7b   : > { %1315 = vmatpush.bf16.msrb.mxu0 %v2039_v44  ;;  %1341 = vmatpush.bf16.msrb.mxu2 %v2055_v50 }
  0x7d   : > { %1328 = vmatpush.bf16.msrb.mxu1 %v2047_v45  ;;  %1354 = vmatpush.bf16.msrb.mxu3 %v2063_v51 }
  0x7f   : > { %1316 = vmatpush.bf16.msrb.mxu0 %v2038_v48  ;;  %1342 = vmatpush.bf16.msrb.mxu2 %v2054_v54 }
  0x81   : > { %1329 = vmatpush.bf16.msrb.mxu1 %v2046_v49  ;;  %1355 = vmatpush.bf16.msrb.mxu3 %v2062_v56 }
  0x83   : > { %1317 = vmatpush.bf16.msrb.mxu0 %v2037_v52  ;;  %1343 = vmatpush.bf16.msrb.mxu2 %v2053_v61 }
  0x85   : > { %1330 = vmatpush.bf16.msrb.mxu1 %v2045_v53  ;;  %1356 = vmatpush.bf16.msrb.mxu3 %v2061_v62 }
  0x87   : > { %1318 = vmatpush.bf16.msrb.mxu0 %v2036_v57  ;;  %1344 = vmatpush.bf16.msrb.mxu2 %v2052_v4 }
  0x89   : > { %1331 = vmatpush.bf16.msrb.mxu1 %v2044_v60  ;;  %1357 = vmatpush.bf16.msrb.mxu3 %v2060_v5 }
  0x8b   : > { %1319 = vmatpush.bf16.msrb.mxu0 %v2035_v0  ;;  %1345 = vmatpush.bf16.msrb.mxu2 %v2051_v13 }
  0x8d   : > { %1332 = vmatpush.bf16.msrb.mxu1 %v2043_v3  ;;  %1358 = vmatpush.bf16.msrb.mxu3 %v2059_v14 }
  0xab   : > { %v633_v1 = vpop.f32.mrf.mxu0 }
  0xac   : > { %v634_v2 = vadd.f32 %v633_v1, %v288_v59 }
  0xad   : > { %v646_v7 = vpop.f32.mrf.mxu1 }
  0xae   : > { %v728_v9 = vmax.f32 %v634_v2, 0.0  ;;  %v647_v10 = vadd.f32 %v646_v7, %v289_v63 }
  0xb0   : > { %v736_v12 = vpack.c.bf16 %v728_v9, %v728_v9  ;;  %v729_v55 = vmax.f32 %v647_v10, 0.0 }
  0xb1   : > { %v659_v11 = vpop.f32.mrf.mxu2 }
  0xb2   : > { %v660_v15 = vadd.f32 %v659_v11, %v290_v6  ;;  %v737_v18 = vpack.c.bf16 %v729_v55, %v729_v55  ;;  %1268 = vmatmul.bf16.vlgmr.msra.gmra.mxu0 %v736_v12 }
  0xb3   : > { %v635_v20 = vpop.f32.mrf.mxu0 }
  0xb4   : > { %v672_v16 = vpop.f32.mrf.mxu3  ;;  %v730_v19 = vmax.f32 %v660_v15, 0.0  ;;  %1281 = vmatmul.bf16.vlgmr.msra.gmra.mxu1 %v737_v18 }
  0xb5   : > { %v673_v17 = vadd.f32 %v672_v16, %v291_v8  ;;  %v648_v23 = vpop.f32.mrf.mxu1 }
  0xb6   : > { %v738_v22 = vpack.c.bf16 %v730_v19, %v730_v19 }
  0xb7   : > { %v731_v21 = vmax.f32 %v673_v17, 0.0 }
  0xb8   : > { %1294 = vmatmul.bf16.vlgmr.msra.gmra.mxu2 %v738_v22 }
  0xb9   : > { %v739_v24 = vpack.c.bf16 %v731_v21, %v731_v21  ;;  %v661_v25 = vpop.f32.mrf.mxu2 }
  0xbb   : > { %1307 = vmatmul.bf16.vlgmr.msra.gmra.mxu3 %v739_v24 }
  0xbc   : > { %v674_v26 = vpop.f32.mrf.mxu3 }
  0xcb   : > { %v685_v29 = vpop.f32.mrf.mxu0 }
  0xcc   : > { %v686_v30 = vadd.f32 %v685_v29, %v292_v27 }
  0xcd   : > { %v698_v31 = vpop.f32.mrf.mxu1 }
  0xce   : > { %v732_v32 = vmax.f32 %v686_v30, 0.0  ;;  %v699_v33 = vadd.f32 %v698_v31, %v293_v28 }
  0xd0   : > { %v740_v36 = vpack.c.bf16 %v732_v32, %v732_v32  ;;  %v733_v37 = vmax.f32 %v699_v33, 0.0 }
  0xd1   : > { %v711_v38 = vpop.f32.mrf.mxu2 }
  0xd2   : > { %v741_v39 = vpack.c.bf16 %v733_v37, %v733_v37  ;;  %v712_v40 = vadd.f32 %v711_v38, %v294_v34  ;;  %1320 = vmatmul.bf16.vlgmr.msrb.gmra.mxu0 %v740_v36 }
  0xd3   : > { %v724_v41 = vpop.f32.mrf.mxu3  ;;  %v687_v43 = vpop.f32.mrf.mxu0 }
  0xd4   : > { %v725_v42 = vadd.f32 %v724_v41, %v295_v35  ;;  %v734_v44 = vmax.f32 %v712_v40, 0.0  ;;  %1333 = vmatmul.bf16.vlgmr.msrb.gmra.mxu1 %v741_v39 }
  0xd5   : > { %v700_v46 = vpop.f32.mrf.mxu1 }
  0xd6   : > { %v735_v45 = vmax.f32 %v725_v42, 0.0  ;;  %v742_v47 = vpack.c.bf16 %v734_v44, %v734_v44 }
  0xd8   : > { %v743_v48 = vpack.c.bf16 %v735_v45, %v735_v45  ;;  %1346 = vmatmul.bf16.vlgmr.msrb.gmra.mxu2 %v742_v47 }
  0xd9   : > { %v713_v49 = vpop.f32.mrf.mxu2 }
  0xda   : > { %1359 = vmatmul.bf16.vlgmr.msrb.gmra.mxu3 %v743_v48 }
  0xdb   : > { %v726_v50 = vpop.f32.mrf.mxu3 }
 0x12f   : > { %v1269_v51 = vpop.f32.mrf.mxu0 }
 0x130   : > { %v1270_v61 = vadd.f32 %v2075_v58, %v1269_v51 }
 0x131   : > { %v1282_v52 = vpop.f32.mrf.mxu1 }
 0x132   : > { %v1283_v62 = vadd.f32 %v1282_v52, %v1270_v61 }
 0x137   : > { %v1271_v53 = vpop.f32.mrf.mxu0 }
 0x139   : > { %v1284_v54 = vpop.f32.mrf.mxu1 }
 0x13b   : > { %v1295_v56 = vpop.f32.mrf.mxu2 }
 0x13c   : > { %v1296_v0 = vadd.f32 %v1295_v56, %v1283_v62 }
 0x13e   : > { %v1308_v57 = vpop.f32.mrf.mxu3 }
 0x13f   : > { %v1309_v2 = vadd.f32 %v1308_v57, %v1296_v0 }
 0x143   : > { %v1297_v59 = vpop.f32.mrf.mxu2 }
 0x146   : > { %v1310_v60 = vpop.f32.mrf.mxu3 }
 0x14f   : > { %v1321_v63 = vpop.f32.mrf.mxu0 }
 0x150   : > { %v1322_v3 = vadd.f32 %v1321_v63, %v1309_v2 }
 0x151   : > { %v1334_v1 = vpop.f32.mrf.mxu1 }
 0x152   : > { %v1335_v6 = vadd.f32 %v1334_v1, %v1322_v3 }
 0x157   : > { %v1323_v4 = vpop.f32.mrf.mxu0 }
 0x159   : > { %v1336_v5 = vpop.f32.mrf.mxu1 }
 0x15b   : > { %v1347_v7 = vpop.f32.mrf.mxu2 }
 0x15c   : > { %v1348_v8 = vadd.f32 %v1347_v7, %v1335_v6 }
 0x15d   : > { %v1360_v9 = vpop.f32.mrf.mxu3 }
 0x15e   : > { %v1361_v10 = vadd.f32 %v1360_v9, %v1348_v8 }
 0x160   : > { %1364 = vst [vmem:[%s219_s8] sm:$0xff] %v1361_v10 }
 0x163   : > { %v1349_v11 = vpop.f32.mrf.mxu2 }
 0x165   : > { %v1362_v12 = vpop.f32.mrf.mxu3 }
 0x166 PF: > { %s15_s18 = sadd.s32 1, %s2082_s18  }
 0x167   : > { %p12_p4 = scmp.ge.s32.totalorder %s15_s18, 4  }
 0x169   :  { %14 = sbr.rel (!%p12_p4) target bundleno = 1 (0x1), region = 70 }

</bundles_post_ra>
